<compile_context>
chip_gen: v6e
topology: v6e:2x2x1
jax: 0.10.0
libtpu: 0.0.40
codegen_flags: <defaults>
</compile_context>

<pallas_src>
import numpy as np
import jax
import jax.numpy as jnp
from jax import lax
from jax.experimental import pallas as pl
from jax.experimental.pallas import tpu as pltpu


def _leaky(t):
    return jnp.where(t > 0, t, 0.2 * t)


# ---------------------------------------------------------------------------
# Wrapper-side weight re-layout (pure layout plumbing, done once per call).
# ---------------------------------------------------------------------------
def _banded_conv3_weight(w_oihw, W):
    """OIHW (Cout, Cin, 3, 3) -> (3, W*Cin, W*Cout) banded matrices.

    band[ky, xi*Cin+ci, xo*Cout+co] = w[co, ci, ky, xi-xo+1] if 0<=xi-xo+1<=2 else 0
    so that   out[y, xo*Cout+co] = sum_ky  A[y+ky, :] @ band[ky]
    with A the y-padded, lane-packed (W*Cin) input slab.  The x-direction
    padding of the conv is implicit in the band structure.
    """
    wk = jnp.transpose(w_oihw, (2, 3, 1, 0))            # (3, 3, Cin, Cout) = [ky, kx, ci, co]
    Cin, Cout = wk.shape[2], wk.shape[3]
    xi = np.arange(W)[:, None]
    xo = np.arange(W)[None, :]
    kx = xi - xo + 1                                    # (W, W)
    valid = jnp.asarray((kx >= 0) & (kx <= 2))          # bool (W, W)
    kxc = np.clip(kx, 0, 2)
    band = wk[:, kxc, :, :]                             # (3, W, W, Cin, Cout) = [ky, xi, xo, ci, co]
    band = jnp.where(valid[None, :, :, None, None], band, jnp.zeros((), band.dtype))
    band = jnp.transpose(band, (0, 1, 3, 2, 4))         # (3, W, Cin, W, Cout)
    return band.reshape(3, W * Cin, W * Cout)


def _blockdiag_conv1_weight(ws_oihw, W):
    """1x1 conv OIHW (Cout, Cin, 1, 1) -> block-diagonal (W*Cin, W*Cout)."""
    Cout, Cin = ws_oihw.shape[0], ws_oihw.shape[1]
    w = jnp.transpose(ws_oihw[:, :, 0, 0], (1, 0))      # (Cin, Cout)
    eye = jnp.eye(W, dtype=ws_oihw.dtype)
    blk = eye[:, None, :, None] * w[None, :, None, :]   # (W, Cin, W, Cout)
    return blk.reshape(W * Cin, W * Cout)


# ---------------------------------------------------------------------------
# Kernel
# ---------------------------------------------------------------------------
def _make_resnet_block_kernel(H, W, learned_shortcut):
    def kernel(x_ref, w0_ref, b0_ref, w1_ref, b1_ref, *rest):
        # x_ref : (1, H+2, W*Cin)  f32, y-padded, lane-packed input (one image)
        # w0_ref: (3, W*Cin,  W*Cmid) bf16 banded conv_0 weights (per ky tap)
        # b0_ref: (1, W*Cmid) f32 (bias tiled across W)
        # w1_ref: (3, W*Cmid, W*Cout) bf16 banded conv_1 weights
        # b1_ref: (1, W*Cout) f32
        # ws_ref: (W*Cin, W*Cout) bf16 block-diag 1x1 shortcut (only if learned)
        # out_ref: (1, H, W*Cout) f32, lane-dense output slab
        if learned_shortcut:
            ws_ref, out_ref = rest
        else:
            (out_ref,) = rest

        x = x_ref[0]                                     # (H+2, W*Cin) f32

        def act_bf16(t):                                 # leaky_relu(0.2) in f32, bf16 MXU operand
            return jnp.where(t > 0, t, 0.2 * t).astype(jnp.bfloat16)

        # ---- conv_0 (3x3, pad=1): one matmul per ky tap, K = W*Cin ----
        # leaky(0) == 0, so activating the y-padded slab keeps the pad rows zero.
        acc0 = jnp.dot(act_bf16(x[0:H]), w0_ref[0], preferred_element_type=jnp.float32)
        acc0 = acc0 + jnp.dot(act_bf16(x[1:H + 1]), w0_ref[1],
                              preferred_element_type=jnp.float32)
        acc0 = acc0 + jnp.dot(act_bf16(x[2:H + 2]), w0_ref[2],
                              preferred_element_type=jnp.float32)
        h0 = acc0 + b0_ref[...]                          # (H, W*Cmid) f32

        # ---- conv_1 (3x3, pad=1) ----
        # y-shifted neighbour rows of the activation are produced with tiny 0/1
        # shift matmuls (exact), avoiding any padded VMEM scratch round-trip.
        a1 = act_bf16(h0)                                # (H, W*Cmid) bf16
        row = lax.broadcasted_iota(jnp.int32, (H, H), 0)
        col = lax.broadcasted_iota(jnp.int32, (H, H), 1)
        dn = jnp.where(col == row - 1, 1.0, 0.0).astype(jnp.bfloat16)   # row y <- a1[y-1]
        up = jnp.where(col == row + 1, 1.0, 0.0).astype(jnp.bfloat16)   # row y <- a1[y+1]
        a1_dn = jnp.dot(dn, a1, preferred_element_type=jnp.float32).astype(jnp.bfloat16)
        a1_up = jnp.dot(up, a1, preferred_element_type=jnp.float32).astype(jnp.bfloat16)

        acc1 = jnp.dot(a1_dn, w1_ref[0], preferred_element_type=jnp.float32)
        acc1 = acc1 + jnp.dot(a1, w1_ref[1], preferred_element_type=jnp.float32)
        acc1 = acc1 + jnp.dot(a1_up, w1_ref[2], preferred_element_type=jnp.float32)
        dx = acc1 + b1_ref[...]                          # (H, W*Cout) f32

        # ---- shortcut ----
        x_mid = x[1:H + 1, :]                            # raw (unactivated) x rows, f32
        if learned_shortcut:
            xs = jnp.dot(x_mid.astype(jnp.bfloat16), ws_ref[...],
                         preferred_element_type=jnp.float32)
        else:
            xs = x_mid                                   # exact identity (Cin == Cout)

        out_ref[0] = xs + dx                             # lane-dense (H, 128) unmasked store
    return kernel


# ---------------------------------------------------------------------------
# Host-side wrapper
# ---------------------------------------------------------------------------
def resnet_block_forward(x_nhwc, w0, b0, w1, b1, ws=None):
    """x_nhwc: (N, H, W, Cin) f32. Conv weights in OIHW. ws=None -> identity shortcut."""
    N, H, W, Cin = x_nhwc.shape
    Cmid, Cout = w0.shape[0], w1.shape[0]
    learned = ws is not None
    if not learned:
        assert Cin == Cout, "identity shortcut requires fin == fout"

    # Lane-packed, y-padded input slab (pad-then-activate == activate-then-pad for leaky).
    x_slab = jnp.pad(x_nhwc, ((0, 0), (1, 1), (0, 0), (0, 0)))
    x_slab = x_slab.reshape(N, H + 2, W * Cin).astype(jnp.float32)

    # bf16 MXU operands; banded / block-diag re-layout.
    w0b = _banded_conv3_weight(w0.astype(jnp.bfloat16), W)       # (3, W*Cin,  W*Cmid)
    w1b = _banded_conv3_weight(w1.astype(jnp.bfloat16), W)       # (3, W*Cmid, W*Cout)
    b0r = jnp.tile(b0.astype(jnp.float32), W)[None, :]           # (1, W*Cmid)
    b1r = jnp.tile(b1.astype(jnp.float32), W)[None, :]           # (1, W*Cout)

    inputs = [x_slab, w0b, b0r, w1b, b1r]
    in_specs = [
        pl.BlockSpec((1, H + 2, W * Cin), lambda n: (n, 0, 0)),
        pl.BlockSpec((3, W * Cin, W * Cmid), lambda n: (0, 0, 0)),
        pl.BlockSpec((1, W * Cmid), lambda n: (0, 0)),
        pl.BlockSpec((3, W * Cmid, W * Cout), lambda n: (0, 0, 0)),
        pl.BlockSpec((1, W * Cout), lambda n: (0, 0)),
    ]
    if learned:
        wsb = _blockdiag_conv1_weight(ws.astype(jnp.bfloat16), W)  # (W*Cin, W*Cout)
        inputs.append(wsb)
        in_specs.append(pl.BlockSpec((W * Cin, W * Cout), lambda n: (0, 0)))

    out = pl.pallas_call(
        _make_resnet_block_kernel(H, W, learned),
        out_shape=jax.ShapeDtypeStruct((N, H, W * Cout), jnp.float32),
        grid_spec=pltpu.PrefetchScalarGridSpec(
            num_scalar_prefetch=0,
            grid=(N,),                                   # one image per step; weights stay resident
            in_specs=in_specs,
            out_specs=pl.BlockSpec((1, H, W * Cout), lambda n: (n, 0, 0)),
        ),
        compiler_params=pltpu.CompilerParams(
            dimension_semantics=("parallel",)),          # N=2 -> both v7x TensorCores busy
    )(*inputs)

    return out.reshape(N, H, W, Cout)


# ---------------------------------------------------------------------------
# Spectral norm (exact) + plain-JAX reference for correctness checking
# ---------------------------------------------------------------------------
def spectral_normalize(w_oihw):
    """Exact spectral norm (power-iteration fixed point): W / sigma_max(W.view(cout,-1))."""
    cout = w_oihw.shape[0]
    sigma = jnp.linalg.svd(w_oihw.reshape(cout, -1), compute_uv=False)[0]
    return w_oihw / sigma


def reference_forward(x_nhwc, w0, b0, w1, b1, ws=None):
    """Plain-JAX reference using the same bf16 operands / f32 accumulation as the kernel."""
    f32 = jnp.float32
    q = lambda t: t.astype(jnp.bfloat16).astype(f32)     # mimic bf16 MXU operands exactly

    def conv(x, w_oihw, pad):
        w_hwio = jnp.transpose(q(w_oihw), (2, 3, 1, 0))
        return lax.conv_general_dilated(
            x, w_hwio, (1, 1), [(pad, pad), (pad, pad)],
            dimension_numbers=('NHWC', 'HWIO', 'NHWC'),
            preferred_element_type=f32)

    x_s = conv(q(x_nhwc), ws, 0) if ws is not None else x_nhwc
    dx = conv(q(_leaky(x_nhwc)), w0, 1) + b0
    dx = conv(q(_leaky(dx)), w1, 1) + b1
    return x_s + dx


if __name__ == "__main__":
    key = jax.random.PRNGKey(0)
    k_cfg1, k_cfg2 = jax.random.split(key, 2)

    # ---- Config 1: fin != fout -> learned 1x1 shortcut (conv_s) ----
    N, fin, fout, H, W = 2, 4, 8, 16, 16
    fmid = min(fin, fout)
    kx, k0, kb0, k1, kb1, ks = jax.random.split(k_cfg1, 6)
    x_nchw = jax.random.normal(kx, (N, fin, H, W), jnp.float32)   # PyTorch NCHW input
    x_nhwc = jnp.transpose(x_nchw, (0, 2, 3, 1))
    w0 = spectral_normalize(0.1 * jax.random.normal(k0, (fmid, fin, 3, 3), jnp.float32))
    b0 = 0.1 * jax.random.normal(kb0, (fmid,), jnp.float32)
    w1 = spectral_normalize(0.1 * jax.random.normal(k1, (fout, fmid, 3, 3), jnp.float32))
    b1 = 0.1 * jax.random.normal(kb1, (fout,), jnp.float32)
    ws = spectral_normalize(0.1 * jax.random.normal(ks, (fout, fin, 1, 1), jnp.float32))

    out = jax.block_until_ready(resnet_block_forward(x_nhwc, w0, b0, w1, b1, ws))
    ref = reference_forward(x_nhwc, w0, b0, w1, b1, ws)
    np.testing.assert_allclose(np.asarray(out), np.asarray(ref), rtol=1e-3, atol=1e-3)

    # ---- Config 2: fin == fout -> identity shortcut (shortcut matmul skipped) ----
    f2 = 8
    kx2, k02, kb02, k12, kb12 = jax.random.split(k_cfg2, 5)
    x2_nchw = jax.random.normal(kx2, (N, f2, H, W), jnp.float32)
    x2_nhwc = jnp.transpose(x2_nchw, (0, 2, 3, 1))
    w0_2 = spectral_normalize(0.1 * jax.random.normal(k02, (f2, f2, 3, 3), jnp.float32))
    b0_2 = 0.1 * jax.random.normal(kb02, (f2,), jnp.float32)
    w1_2 = spectral_normalize(0.1 * jax.random.normal(k12, (f2, f2, 3, 3), jnp.float32))
    b1_2 = 0.1 * jax.random.normal(kb12, (f2,), jnp.float32)

    out2 = jax.block_until_ready(resnet_block_forward(x2_nhwc, w0_2, b0_2, w1_2, b1_2, None))
    ref2 = reference_forward(x2_nhwc, w0_2, b0_2, w1_2, b1_2, None)
    np.testing.assert_allclose(np.asarray(out2), np.asarray(ref2), rtol=1e-3, atol=1e-3)

    print("KERNEL_OK")
</pallas_src>

<mosaic_0001>
module attributes {stable_mosaic.version = 11 : i64} {
  func.func @kernel(%arg0: i32, %arg1: memref<1x18x64xf32, #tpu.memory_space<vmem>>, %arg2: memref<3x64x64xbf16, #tpu.memory_space<vmem>>, %arg3: memref<1x64xf32, #tpu.memory_space<vmem>>, %arg4: memref<3x64x128xbf16, #tpu.memory_space<vmem>>, %arg5: memref<1x128xf32, #tpu.memory_space<vmem>>, %arg6: memref<64x128xbf16, #tpu.memory_space<vmem>>, %arg7: memref<1x16x128xf32, #tpu.memory_space<vmem>>) attributes {dimension_semantics = [#tpu.dimension_semantics<parallel>], iteration_bounds = array<i64: 2>, scalar_prefetch = 0 : i64, scratch_operands = 0 : i64, tpu.core_type = #tpu.core_type<tc>, window_params = [{transform_indices = @transform_0, window_bounds = array<i64: 1, 18, 64>}, {pipeline_mode = #tpu.pipeline_mode<synchronous>, transform_indices = @transform_1, window_bounds = array<i64: 3, 64, 64>}, {pipeline_mode = #tpu.pipeline_mode<synchronous>, transform_indices = @transform_2, window_bounds = array<i64: 1, 64>}, {pipeline_mode = #tpu.pipeline_mode<synchronous>, transform_indices = @transform_3, window_bounds = array<i64: 3, 64, 128>}, {pipeline_mode = #tpu.pipeline_mode<synchronous>, transform_indices = @transform_4, window_bounds = array<i64: 1, 128>}, {pipeline_mode = #tpu.pipeline_mode<synchronous>, transform_indices = @transform_5, window_bounds = array<i64: 64, 128>}, {transform_indices = @transform_6, window_bounds = array<i64: 1, 16, 128>}]} {
    %c0 = arith.constant 0 : index
    %c0_0 = arith.constant 0 : index
    %c0_1 = arith.constant 0 : index
    %0 = vector.load %arg1[%c0, %c0_0, %c0_1] : memref<1x18x64xf32, #tpu.memory_space<vmem>>, vector<1x18x64xf32>
    %1 = vector.shape_cast %0 : vector<1x18x64xf32> to vector<18x64xf32>
    %2 = vector.extract_strided_slice %1 {offsets = [0, 0], sizes = [16, 64], strides = [1, 1]} : vector<18x64xf32> to vector<16x64xf32>
    %cst = arith.constant 0.000000e+00 : f32
    %3 = vector.broadcast %cst : f32 to vector<16x64xf32>
    %4 = arith.cmpf ogt, %2, %3 : vector<16x64xf32>
    %cst_2 = arith.constant 2.000000e-01 : f32
    %5 = vector.broadcast %cst_2 : f32 to vector<16x64xf32>
    %6 = arith.mulf %5, %2 : vector<16x64xf32>
    %7 = arith.select %4, %2, %6 : vector<16x64xi1>, vector<16x64xf32>
    %8 = arith.truncf %7 : vector<16x64xf32> to vector<16x64xbf16>
    %c0_3 = arith.constant 0 : index
    %c0_4 = arith.constant 0 : index
    %c0_5 = arith.constant 0 : index
    %9 = vector.load %arg2[%c0_3, %c0_4, %c0_5] : memref<3x64x64xbf16, #tpu.memory_space<vmem>>, vector<1x64x64xbf16>
    %10 = vector.shape_cast %9 : vector<1x64x64xbf16> to vector<64x64xbf16>
    %cst_6 = arith.constant dense<0.000000e+00> : vector<16x64xf32>
    %11 = tpu.matmul %8, %10, %cst_6 {dimension_numbers = #tpu.dot_dimension_numbers<[1], [0], [0], [1], [0, 0, 1, 1], [], []>} : vector<16x64xbf16>, vector<64x64xbf16>, vector<16x64xf32> -> vector<16x64xf32>
    %12 = vector.extract_strided_slice %1 {offsets = [1, 0], sizes = [16, 64], strides = [1, 1]} : vector<18x64xf32> to vector<16x64xf32>
    %cst_7 = arith.constant 0.000000e+00 : f32
    %13 = vector.broadcast %cst_7 : f32 to vector<16x64xf32>
    %14 = arith.cmpf ogt, %12, %13 : vector<16x64xf32>
    %cst_8 = arith.constant 2.000000e-01 : f32
    %15 = vector.broadcast %cst_8 : f32 to vector<16x64xf32>
    %16 = arith.mulf %15, %12 : vector<16x64xf32>
    %17 = arith.select %14, %12, %16 : vector<16x64xi1>, vector<16x64xf32>
    %18 = arith.truncf %17 : vector<16x64xf32> to vector<16x64xbf16>
    %c1 = arith.constant 1 : index
    %c0_9 = arith.constant 0 : index
    %c0_10 = arith.constant 0 : index
    %19 = vector.load %arg2[%c1, %c0_9, %c0_10] : memref<3x64x64xbf16, #tpu.memory_space<vmem>>, vector<1x64x64xbf16>
    %20 = vector.shape_cast %19 : vector<1x64x64xbf16> to vector<64x64xbf16>
    %cst_11 = arith.constant dense<0.000000e+00> : vector<16x64xf32>
    %21 = tpu.matmul %18, %20, %cst_11 {dimension_numbers = #tpu.dot_dimension_numbers<[1], [0], [0], [1], [0, 0, 1, 1], [], []>} : vector<16x64xbf16>, vector<64x64xbf16>, vector<16x64xf32> -> vector<16x64xf32>
    %22 = arith.addf %11, %21 : vector<16x64xf32>
    %23 = vector.extract_strided_slice %1 {offsets = [2, 0], sizes = [16, 64], strides = [1, 1]} : vector<18x64xf32> to vector<16x64xf32>
    %cst_12 = arith.constant 0.000000e+00 : f32
    %24 = vector.broadcast %cst_12 : f32 to vector<16x64xf32>
    %25 = arith.cmpf ogt, %23, %24 : vector<16x64xf32>
    %cst_13 = arith.constant 2.000000e-01 : f32
    %26 = vector.broadcast %cst_13 : f32 to vector<16x64xf32>
    %27 = arith.mulf %26, %23 : vector<16x64xf32>
    %28 = arith.select %25, %23, %27 : vector<16x64xi1>, vector<16x64xf32>
    %29 = arith.truncf %28 : vector<16x64xf32> to vector<16x64xbf16>
    %c2 = arith.constant 2 : index
    %c0_14 = arith.constant 0 : index
    %c0_15 = arith.constant 0 : index
    %30 = vector.load %arg2[%c2, %c0_14, %c0_15] : memref<3x64x64xbf16, #tpu.memory_space<vmem>>, vector<1x64x64xbf16>
    %31 = vector.shape_cast %30 : vector<1x64x64xbf16> to vector<64x64xbf16>
    %cst_16 = arith.constant dense<0.000000e+00> : vector<16x64xf32>
    %32 = tpu.matmul %29, %31, %cst_16 {dimension_numbers = #tpu.dot_dimension_numbers<[1], [0], [0], [1], [0, 0, 1, 1], [], []>} : vector<16x64xbf16>, vector<64x64xbf16>, vector<16x64xf32> -> vector<16x64xf32>
    %33 = arith.addf %22, %32 : vector<16x64xf32>
    %c0_17 = arith.constant 0 : index
    %c0_18 = arith.constant 0 : index
    %34 = vector.load %arg3[%c0_17, %c0_18] : memref<1x64xf32, #tpu.memory_space<vmem>>, vector<1x64xf32>
    %35 = vector.broadcast %34 : vector<1x64xf32> to vector<16x64xf32>
    %36 = arith.addf %33, %35 : vector<16x64xf32>
    %cst_19 = arith.constant 0.000000e+00 : f32
    %37 = vector.broadcast %cst_19 : f32 to vector<16x64xf32>
    %38 = arith.cmpf ogt, %36, %37 : vector<16x64xf32>
    %cst_20 = arith.constant 2.000000e-01 : f32
    %39 = vector.broadcast %cst_20 : f32 to vector<16x64xf32>
    %40 = arith.mulf %39, %36 : vector<16x64xf32>
    %41 = arith.select %38, %36, %40 : vector<16x64xi1>, vector<16x64xf32>
    %42 = arith.truncf %41 : vector<16x64xf32> to vector<16x64xbf16>
    %43 = tpu.iota {dimensions = array<i32: 0>} : vector<16x16xi32>
    %44 = tpu.iota {dimensions = array<i32: 1>} : vector<16x16xi32>
    %c1_i32 = arith.constant 1 : i32
    %45 = vector.broadcast %c1_i32 : i32 to vector<16x16xi32>
    %46 = arith.subi %43, %45 : vector<16x16xi32>
    %47 = arith.cmpi eq, %44, %46 : vector<16x16xi32>
    %cst_21 = arith.constant 1.000000e+00 : f32
    %cst_22 = arith.constant 0.000000e+00 : f32
    %48 = vector.broadcast %cst_21 : f32 to vector<16x16xf32>
    %49 = vector.broadcast %cst_22 : f32 to vector<16x16xf32>
    %50 = arith.select %47, %48, %49 : vector<16x16xi1>, vector<16x16xf32>
    %51 = arith.truncf %50 : vector<16x16xf32> to vector<16x16xbf16>
    %c1_i32_23 = arith.constant 1 : i32
    %52 = vector.broadcast %c1_i32_23 : i32 to vector<16x16xi32>
    %53 = arith.addi %43, %52 : vector<16x16xi32>
    %54 = arith.cmpi eq, %44, %53 : vector<16x16xi32>
    %cst_24 = arith.constant 1.000000e+00 : f32
    %cst_25 = arith.constant 0.000000e+00 : f32
    %55 = vector.broadcast %cst_24 : f32 to vector<16x16xf32>
    %56 = vector.broadcast %cst_25 : f32 to vector<16x16xf32>
    %57 = arith.select %54, %55, %56 : vector<16x16xi1>, vector<16x16xf32>
    %58 = arith.truncf %57 : vector<16x16xf32> to vector<16x16xbf16>
    %cst_26 = arith.constant dense<0.000000e+00> : vector<16x64xf32>
    %59 = tpu.matmul %51, %42, %cst_26 {dimension_numbers = #tpu.dot_dimension_numbers<[1], [0], [0], [1], [0, 0, 1, 1], [], []>} : vector<16x16xbf16>, vector<16x64xbf16>, vector<16x64xf32> -> vector<16x64xf32>
    %60 = arith.truncf %59 : vector<16x64xf32> to vector<16x64xbf16>
    %cst_27 = arith.constant dense<0.000000e+00> : vector<16x64xf32>
    %61 = tpu.matmul %58, %42, %cst_27 {dimension_numbers = #tpu.dot_dimension_numbers<[1], [0], [0], [1], [0, 0, 1, 1], [], []>} : vector<16x16xbf16>, vector<16x64xbf16>, vector<16x64xf32> -> vector<16x64xf32>
    %62 = arith.truncf %61 : vector<16x64xf32> to vector<16x64xbf16>
    %c0_28 = arith.constant 0 : index
    %c0_29 = arith.constant 0 : index
    %c0_30 = arith.constant 0 : index
    %63 = vector.load %arg4[%c0_28, %c0_29, %c0_30] : memref<3x64x128xbf16, #tpu.memory_space<vmem>>, vector<1x64x128xbf16>
    %64 = vector.shape_cast %63 : vector<1x64x128xbf16> to vector<64x128xbf16>
    %cst_31 = arith.constant dense<0.000000e+00> : vector<16x128xf32>
    %65 = tpu.matmul %60, %64, %cst_31 {dimension_numbers = #tpu.dot_dimension_numbers<[1], [0], [0], [1], [0, 0, 1, 1], [], []>} : vector<16x64xbf16>, vector<64x128xbf16>, vector<16x128xf32> -> vector<16x128xf32>
    %c1_32 = arith.constant 1 : index
    %c0_33 = arith.constant 0 : index
    %c0_34 = arith.constant 0 : index
    %66 = vector.load %arg4[%c1_32, %c0_33, %c0_34] : memref<3x64x128xbf16, #tpu.memory_space<vmem>>, vector<1x64x128xbf16>
    %67 = vector.shape_cast %66 : vector<1x64x128xbf16> to vector<64x128xbf16>
    %cst_35 = arith.constant dense<0.000000e+00> : vector<16x128xf32>
    %68 = tpu.matmul %42, %67, %cst_35 {dimension_numbers = #tpu.dot_dimension_numbers<[1], [0], [0], [1], [0, 0, 1, 1], [], []>} : vector<16x64xbf16>, vector<64x128xbf16>, vector<16x128xf32> -> vector<16x128xf32>
    %69 = arith.addf %65, %68 : vector<16x128xf32>
    %c2_36 = arith.constant 2 : index
    %c0_37 = arith.constant 0 : index
    %c0_38 = arith.constant 0 : index
    %70 = vector.load %arg4[%c2_36, %c0_37, %c0_38] : memref<3x64x128xbf16, #tpu.memory_space<vmem>>, vector<1x64x128xbf16>
    %71 = vector.shape_cast %70 : vector<1x64x128xbf16> to vector<64x128xbf16>
    %cst_39 = arith.constant dense<0.000000e+00> : vector<16x128xf32>
    %72 = tpu.matmul %62, %71, %cst_39 {dimension_numbers = #tpu.dot_dimension_numbers<[1], [0], [0], [1], [0, 0, 1, 1], [], []>} : vector<16x64xbf16>, vector<64x128xbf16>, vector<16x128xf32> -> vector<16x128xf32>
    %73 = arith.addf %69, %72 : vector<16x128xf32>
    %c0_40 = arith.constant 0 : index
    %c0_41 = arith.constant 0 : index
    %74 = vector.load %arg5[%c0_40, %c0_41] : memref<1x128xf32, #tpu.memory_space<vmem>>, vector<1x128xf32>
    %75 = vector.broadcast %74 : vector<1x128xf32> to vector<16x128xf32>
    %76 = arith.addf %73, %75 : vector<16x128xf32>
    %77 = vector.extract_strided_slice %1 {offsets = [1, 0], sizes = [16, 64], strides = [1, 1]} : vector<18x64xf32> to vector<16x64xf32>
    %78 = arith.truncf %77 : vector<16x64xf32> to vector<16x64xbf16>
    %c0_42 = arith.constant 0 : index
    %c0_43 = arith.constant 0 : index
    %79 = vector.load %arg6[%c0_42, %c0_43] : memref<64x128xbf16, #tpu.memory_space<vmem>>, vector<64x128xbf16>
    %cst_44 = arith.constant dense<0.000000e+00> : vector<16x128xf32>
    %80 = tpu.matmul %78, %79, %cst_44 {dimension_numbers = #tpu.dot_dimension_numbers<[1], [0], [0], [1], [0, 0, 1, 1], [], []>} : vector<16x64xbf16>, vector<64x128xbf16>, vector<16x128xf32> -> vector<16x128xf32>
    %81 = arith.addf %80, %76 : vector<16x128xf32>
    %c0_45 = arith.constant 0 : index
    %c0_46 = arith.constant 0 : index
    %c0_47 = arith.constant 0 : index
    %82 = vector.load %arg7[%c0_45, %c0_46, %c0_47] : memref<1x16x128xf32, #tpu.memory_space<vmem>>, vector<1x16x128xf32>
    %83 = vector.shape_cast %82 : vector<1x16x128xf32> to vector<16x128xf32>
    %84 = vector.shape_cast %81 : vector<16x128xf32> to vector<1x16x128xf32>
    tpu.vector_store %arg7[%c0_45, %c0_46, %c0_47], %84 {strides = array<i32>} : memref<1x16x128xf32, #tpu.memory_space<vmem>>, vector<1x16x128xf32>,
    return
  }
  func.func @transform_0(%arg0: i32) -> (i32, i32, i32) {
    %c0_i32 = arith.constant 0 : i32
    %c0_i32_0 = arith.constant 0 : i32
    %c0_i32_1 = arith.constant 0 : i32
    return %arg0, %c0_i32, %c0_i32_0 : i32, i32, i32
  }
  func.func @transform_1(%arg0: i32) -> (i32, i32, i32) {
    %c0_i32 = arith.constant 0 : i32
    %c0_i32_0 = arith.constant 0 : i32
    %c0_i32_1 = arith.constant 0 : i32
    %c0_i32_2 = arith.constant 0 : i32
    return %c0_i32, %c0_i32_0, %c0_i32_1 : i32, i32, i32
  }
  func.func @transform_2(%arg0: i32) -> (i32, i32) {
    %c0_i32 = arith.constant 0 : i32
    %c0_i32_0 = arith.constant 0 : i32
    %c0_i32_1 = arith.constant 0 : i32
    return %c0_i32, %c0_i32_0 : i32, i32
  }
  func.func @transform_3(%arg0: i32) -> (i32, i32, i32) {
    %c0_i32 = arith.constant 0 : i32
    %c0_i32_0 = arith.constant 0 : i32
    %c0_i32_1 = arith.constant 0 : i32
    %c0_i32_2 = arith.constant 0 : i32
    return %c0_i32, %c0_i32_0, %c0_i32_1 : i32, i32, i32
  }
  func.func @transform_4(%arg0: i32) -> (i32, i32) {
    %c0_i32 = arith.constant 0 : i32
    %c0_i32_0 = arith.constant 0 : i32
    %c0_i32_1 = arith.constant 0 : i32
    return %c0_i32, %c0_i32_0 : i32, i32
  }
  func.func @transform_5(%arg0: i32) -> (i32, i32) {
    %c0_i32 = arith.constant 0 : i32
    %c0_i32_0 = arith.constant 0 : i32
    %c0_i32_1 = arith.constant 0 : i32
    return %c0_i32, %c0_i32_0 : i32, i32
  }
  func.func @transform_6(%arg0: i32) -> (i32, i32, i32) {
    %c0_i32 = arith.constant 0 : i32
    %c0_i32_0 = arith.constant 0 : i32
    %c0_i32_1 = arith.constant 0 : i32
    return %arg0, %c0_i32, %c0_i32_0 : i32, i32, i32
  }
}

</mosaic_0001>

<bundles_post_ra>
// kernel: tpu_custom_call.1
= control target key start
LH: loop header
LB: loop body
LE: loop exit
PB: predicated region body
PF: predicated region fallthrough
CT: control target
= control target key end

     0   :  { %11 = vsyncpa [#allocation3], 0  ;;  %s1797_s0 = inlined_call_operand.vmem [shape: f32[2,18,64], index: 0, kind: input, shape index: {}]   ;;  %s1798_s1 = inlined_call_operand.hbm [shape: bf16[3,64,64], index: 1, kind: input, shape index: {}]   ;;  %s1799_s2 = inlined_call_operand.vmem [shape: f32[1,64], index: 2, kind: input, shape index: {}]   ;;  %s1800_s3 = inlined_call_operand.hbm [shape: bf16[3,64,128], index: 3, kind: input, shape index: {}]   ;;  %s1801_s4 = inlined_call_operand.vmem [shape: f32[1,128], index: 4, kind: input, shape index: {}]   ;;  %s1802_s5 = inlined_call_operand.vmem [shape: bf16[64,128], index: 5, kind: input, shape index: {}]   ;;  %s1803_s6 = inlined_call_operand.hbm [shape: f32[2,16,128], index: 6, kind: output, shape index: {}]  }
   0x1   :  { %12 = vsyncpa [#allocation6], 0 }
   0x2   :  { %13 = vsyncpa [#allocation4], 0 }
   0x3   :  { %15 = vsyncpa [#allocation4 + $0x1], 0  ;;  %s1556_s21 = smov 0   ;;  %s1558_s22 = smov 0  }
   0x4   :  { %s1560_s23 = smov 0   ;;  %s1562_s24 = smov 0  }
   0x5 LB: > { %s1577_s25 = sadd.s32 4294967295, %s1510_s24   ;;  %s1103_s26 = sadd.s32 4294967294, %s1510_s24   ;;  %s1510_s24 = sphi %s1562_s24, %s1817_s24   ;;  %s1506_s23 = sphi %s1560_s23, %s1816_s23   ;;  %s1502_s22 = sphi %s1558_s22, %s1815_s22   ;;  %s1498_s21 = sphi %s1556_s21, %s1814_s21  }
   0x6   : > { %s1581_s27 = sadd.s32 1, %s1510_s24   ;;  %s159_s28 = sadd.s32 1, %s1506_s23 }
   0x7   : > { %s156_s29 = ssub.s32 %s1510_s24, %s1581_s27  ;;  %p169_p0 = scmp.ne.s32.totalorder %s1506_s23, %s1502_s22 }
   0x8   : > { %p157_p1 = scmp.eq.s32.totalorder %s156_s29, 0  ;;  %p170_p2 = scmp.eq.s32.totalorder %s1577_s25, 1 }
   0x9   : > { %p175_p3 = scmp.ne.s32.totalorder %s1502_s22, %s1498_s21  ;;  %p176_p4 = scmp.eq.s32.totalorder %s1103_s26, 1 }
   0xa   : > { %s1592_s30 = scalar_select %p157_p1, %s1506_s23, %s159_s28  }
   0xb   : > { %p1594_p5 = por %p170_p2, %p169_p0  ;;  %p1598_p6 = por %p176_p4, %p175_p3 }
   0xc   : > { %p1104_p7 = scmp.ge.s32.totalorder %s1510_s24, 1  ;;  %p183_p8 = scmp.lt.s32.totalorder %s1510_s24, 3 }
   0xd   : > { %s1806_s8 = scalar_select %p1598_p6, 1, 0 }
   0xe   : > { %p1804_p9 = scmp.eq.s32.totalorder %s1577_s25, 0  ;;  %p1605_p10 = pnand %p1104_p7, %p183_p8 }
   0xf   : > { %s1512_s10 = smov [#allocation2]   ;;  %s1513_s13 = smov [#allocation5]  }
  0x10   : > { %s195_s11 = sshll.u32 %s1512_s10, 4  ;;  %p1306_p11 = pneg %p1605_p10  ;;  %s196_s11 = int_to_ptr.vmem [resolvable:$true] %s195_s11 }
  0x11   : > { %s211_s14 = sshll.u32 %s1513_s13, 4  ;;  %s1401_s15 = scalar_lea.vmem %s196_s11, 1536  ;;  %s212_s14 = int_to_ptr.vmem [resolvable:$true] %s211_s14 }
  0x12   : > { %p1613_p12 = pnand %p1804_p9, %p1306_p11  ;;  %p1402_p0 = scmp.ne.s32.totalorder %s196_s11, %s1401_s15 }
  0x13   : > { %p1409_p3 = scmp.lt.s32.totalorder %s196_s11, %s196_s11  ;;  %p1410_p4 = scmp.lt.s32.totalorder %s1401_s15, %s1401_s15 }
  0x14   : > { %p1392_p13 = pneg %p1613_p12 }
  0x15   : > { %p1411_p7 = por %p1410_p4, %p1409_p3 }
  0x16   : > { %p1404_p1 = pnand %p1402_p0, %p1392_p13 }
  0x18   : > { %p1405_p2 = pneg %p1404_p1 }
  0x1a   : > { %p1412_p8 = pnand %p1411_p7, %p1405_p2 }
  0x1c   : > { %1415 = shalt.err (!%p1412_p8)
}
  0x1d   : > { %s1514_s16 = smov 64   ;;  %s1515_s17 = smov 4  }
  0x1e   : > { %1309 = dma.hbm_to_vmem [thread:$0]  (!%p1613_p12), %s1798_s1, 1536, %s196_s11, [#allocation3], %s1514_s16, %s1514_s16, %s1515_s17  }
  0x1f   : > { %s1427_s20 = scalar_lea.vmem %s212_s14, 1536  ;;  %p1435_p9 = scmp.lt.s32.totalorder %s212_s14, %s212_s14 }
  0x20   : > { %p1428_p11 = scmp.ne.s32.totalorder %s212_s14, %s1427_s20  ;;  %p1436_p6 = scmp.lt.s32.totalorder %s1427_s20, %s1427_s20 }
  0x22   : > { %p1430_p0 = pnand %p1428_p11, %p1392_p13  ;;  %p1437_p3 = por %p1436_p6, %p1435_p9 }
  0x24   : > { %p1431_p1 = pneg %p1430_p0 }
  0x26   : > { %p1438_p2 = pnand %p1437_p3, %p1431_p1 }
  0x28   : > { %1441 = shalt.err (!%p1438_p2)
}
  0x29   : > { %1312 = dma.hbm_to_vmem [thread:$0]  (!%p1613_p12), %s1800_s3, 1536, %s212_s14, [#allocation6], %s1514_s16, %s1514_s16, %s1515_s17  }
  0x2a   : > { %241 = sbr.rel (%p1605_p10) target bundleno = 724 (0x2d4), region = 44  ;;  %p1809_p4 = scmp.eq.s32.totalorder (!%p1605_p10), %s1577_s25, 0 }
  0x2f   : > { %1485 = dma.done.wait (%p1809_p4), [#allocation3], 1536   ;;  %p1810_p13 = pmov %p1809_p4 }
  0x30   : > { %p1811_p7 = pmov %p1809_p4 }
  0x31   : > { %1487 = vsyncadd (%p1810_p13), [#allocation3], 4294965760 }
  0x32   : > { %1489 = dma.done.wait (%p1811_p7), [#allocation6], 1536   ;;  %p1812_p6 = pmov %p1809_p4 }
  0x33   : > { %p275_p9 = scmp.lt.s32.totalorder %s1577_s25, 1  ;;  %v1516_v0 = vmov 0.0   ;;  %vm1517_vm0 = vmmov 0   ;;  %v1362_v1 = vld [vmem:[#allocation2 + $0x38] sm:$0xff]   ;;  %v1364_v3 = vld [vmem:[#allocation2 + $0x30] sm:$0xff]   ;;  %v1366_v5 = vld [vmem:[#allocation2 + $0x28] sm:$0xff]   ;;  %v562_v46 = vlaneseq }
  0x34   : > { %1491 = vsyncadd (%p1812_p6), [#allocation6], 4294965760  ;;  %1199 = vmatprep.subr.bf16.mxu0 %v1516_v0  ;;  %1211 = vmatprep.subr.bf16.mxu1 %v1516_v0  ;;  %v1363_v2 = vld [vmem:[#allocation2 + $0x18] sm:$0xff]   ;;  %v1365_v4 = vld [vmem:[#allocation2 + $0x10] sm:$0xff]   ;;  %vm312_vm4 = vsmask.f32 7424 }
  0x35   : > { %1207 = vmatprep.mubr.msk.bf16.mxu0 %vm1517_vm0, %v1516_v0  ;;  %1219 = vmatprep.mubr.msk.bf16.mxu1 %vm1517_vm0, %v1516_v0  ;;  %s276_s29 = scalar_select %p275_p9, %s1577_s25, 1  ;;  %v1367_v6 = vld [vmem:[#allocation2 + $0x8] sm:$0xff]   ;;  %v1368_v7 = vld [vmem:[#allocation2 + $0x20] sm:$0xff]   ;;  %vm349_vm5 = vcmask 523264   ;;  %v1370_v25 = vld [vmem:[#allocation2 + $0x58] sm:$0xff]   ;;  %vm472_vm6 = vcmask 1046528  }
  0x36   : > { %1200 = vmatpush3.bf16.msra.mxu0 %v1362_v1  ;;  %1212 = vmatpush3.bf16.msra.mxu1 %v1363_v2  ;;  %v1369_v13 = vld [vmem:[#allocation2] sm:$0xff]   ;;  %v1371_v28 = vld [vmem:[#allocation2 + $0x50] sm:$0xff]   ;;  %v1372_v29 = vld [vmem:[#allocation2 + $0x48] sm:$0xff]   ;;  %v563_v47 = vshrl.u32 %v562_v46, 7  ;;  %v566_v54 = vand.u32 127, %v562_v46  ;;  %vm581_vm11 = vcmask 130048  }
  0x37   : > { %s1295_s9 = smul.u32 24, %s276_s29  ;;  %1201 = vmatprep.subr.bf16.mxu0 %v1516_v0  ;;  %1213 = vmatprep.subr.bf16.mxu1 %v1516_v0  ;;  %v1373_v30 = vld [vmem:[#allocation2 + $0x40] sm:$0xff]   ;;  %v1374_v34 = vld [vmem:[#allocation5 + $0x38] sm:$0xff]   ;;  %v1375_v35 = vld [vmem:[#allocation5 + $0x30] sm:$0xff]   ;;  %s272_s29 = sand.u32 1, %s1502_s22  }
  0x38   : > { %v1376_v36 = vld [vmem:[#allocation5 + $0x28] sm:$0xff]   ;;  %v1377_v37 = vld [vmem:[#allocation5 + $0x20] sm:$0xff]   ;;  %v564_v49 = vadd.s32 8, %v563_v47  ;;  %v1129_v57 = vadd.s32 4294967295, %v563_v47  ;;  %s1111_s11 = sshll.u32 %s272_s29, 4  ;;  %s1159_s14 = sshll.u32 %s1577_s25, 8 }
  0x39   : > { %s279_s12 = scalar_lea.vmem %s1797_s0, %s1295_s9  ;;  %v1128_v51 = vld [vmem:[%s1799_s2] ss:$0 sm:$0xff]  ;;  %s1755_s17 = scalar_lea.hbm %s1803_s6, %s1159_s14 }
  0x3a   : > { %1202 = vmatpush3.bf16.msra.mxu0 %v1364_v3  ;;  %1214 = vmatpush3.bf16.msra.mxu1 %v1365_v4  ;;  %v1660_v8 = vld [vmem:[%s279_s12] sm:$0xff]  ;;  %v1662_v9 = vld [vmem:[%s279_s12 + $0x8] sm:$0xff]  ;;  %v1664_v10 = vld [vmem:[%s279_s12 + $0x10] sm:$0x3]  ;;  %v1130_v58 = vadd.s32 4294967295, %v564_v49  ;;  %vm569_vm7 = vcmp.eq.s32.totalorder %v566_v54, %v1129_v57  ;;  %s274_s12 = scalar_lea.vmem [#allocation7], %s1111_s11 }
  0x3b   : > { %1203 = vmatprep.subr.bf16.mxu0 %v1516_v0  ;;  %1215 = vmatprep.subr.bf16.mxu1 %v1516_v0  ;;  %vm284_vm1 = vcmp.gt.f32.partialorder %v1660_v8, 0.0  ;;  %vm285_vm2 = vcmp.gt.f32.partialorder %v1662_v9, 0.0  ;;  %v286_v11 = vmul.f32 0.2, %v1660_v8  ;;  %v287_v12 = vmul.f32 0.2, %v1662_v9 }
  0x3c   : > { %vm299_vm3 = vcmp.gt.f32.partialorder %v1664_v10, 0.0  ;;  %v300_v14 = vmul.f32 0.2, %v1664_v10  ;;  %vm570_vm8 = vcmp.eq.s32.totalorder %v566_v54, %v1130_v58  ;;  %v571_v2 = vsel %vm569_vm7, 1.0, %v1516_v0  ;;  %s1019_s13 = sshll.u32 %s274_s12, 4  ;;  %s1757_s18 = scalar_lea.sflag [#allocation4], %s272_s29  ;;  %s1750_s13 = int_to_ptr.vmem [resolvable:$true] %s1019_s13 }
  0x3d   : > { %v288_v15 = vsel %vm284_vm1, %v1660_v8, %v286_v11  ;;  %v289_v16 = vsel %vm285_vm2, %v1662_v9, %v287_v12  ;;  %v572_v3 = vsel %vm570_vm8, 1.0, %v1516_v0  ;;  %s1442_s25 = scalar_lea.vmem %s1750_s13, 256  ;;  %s1518_s19 = smov [#allocation7]  }
  0x3e   : > { %1204 = vmatpush3.bf16.msra.mxu0 %v1366_v5  ;;  %1216 = vmatpush3.bf16.msra.mxu1 %v1367_v6  ;;  %v290_v17 = vpack.c.bf16 %v289_v16, %v288_v15  ;;  %v301_v18 = vsel %vm299_vm3, %v1664_v10, %v300_v14  ;;  %v574_v6 = vadd.s32 1, %v563_v47  ;;  %v573_v12 = vpack.c.bf16 %v572_v3, %v571_v2  ;;  %v1378_v16 = vld [vmem:[#allocation5 + $0x18] sm:$0xff]   ;;  %p1443_p10 = scmp.ne.s32.totalorder %s1750_s13, %s1442_s25  ;;  %s1446_s20 = sshll.u32 %s1518_s19, 4  ;;  %s1447_s20 = int_to_ptr.vmem [resolvable:$false] %s1446_s20 }
  0x3f   : > { %1205 = vmatprep.subr.bf16.mxu0 %v1516_v0  ;;  %1217 = vmatprep.subr.bf16.mxu1 %v1516_v0  ;;  %v302_v19 = vpack.c.bf16 %v301_v18, %v301_v18  ;;  %v1380_v18 = vld [vmem:[#allocation5 + $0x8] sm:$0xff]   ;;  %s1448_s26 = scalar_lea.vmem %s1447_s20, 512  ;;  %p1449_p11 = scmp.lt.s32.totalorder %s1750_s13, %s1447_s20 }
  0x40   : > { %v314_v20 = vshrl.u32 %v290_v17, 16  ;;  %v316_v21 = vshll.u32 %v290_v17, 16  ;;  %v473_v31 = vrot.slane %v290_v17, 1  ;;  %vm576_vm12 = vcmp.eq.s32.totalorder %v566_v54, %v574_v6  ;;  %p1444_p12 = pnand %p1443_p10, %p1594_p5  ;;  %p1450_p0 = scmp.lt.s32.totalorder %s1448_s26, %s1442_s25 }
  0x41   : > { %v321_v22 = vshll.u32 %v302_v19, 16  ;;  %v474_v32 = vrot.slane %v302_v19, 1  ;;  %v1381_v19 = vld [vmem:[#allocation5 + $0x58] sm:$0xff]  }
  0x42   : > { %1206 = vmatpush3.bf16.msra.mxu0 %v1368_v7  ;;  %1218 = vmatpush3.bf16.msra.mxu1 %v1369_v13  ;;  %v318_v23 = vrot.slane %v316_v21, 1  ;;  %v575_v7 = vadd.s32 1, %v564_v49  ;;  %v578_v13 = vsel %vm576_vm12, 1.0, %v1516_v0  ;;  %v1383_v21 = vld [vmem:[#allocation5 + $0x50] sm:$0xff]   ;;  %p1445_p8 = pneg %p1444_p12  ;;  %p1451_p1 = por %p1450_p0, %p1449_p11 }
  0x43   : > { %1223 = vmatprep.subr.bf16.mxu0 %v1516_v0  ;;  %1235 = vmatprep.subr.bf16.mxu1 %v1516_v0  ;;  %v323_v24 = vrot.slane %v321_v22, 1  ;;  %v475_v33 = vsel %vm472_vm6, %v473_v31, %v474_v32  ;;  %v1385_v22 = vld [vmem:[#allocation5 + $0x48] sm:$0xff]   ;;  %v1384_v31 = vld [vmem:[%s1802_s5 + $0x18] sm:$0xff]   ;;  %v913_v32 = vpack.c.bf16 %v1662_v9, %v1660_v8 }
  0x44   : > { %v319_v26 = vor.u32 %v318_v23, %v314_v20  ;;  %vm577_vm13 = vcmp.eq.s32.totalorder %v566_v54, %v575_v7  ;;  %v1382_v20 = vld [vmem:[#allocation5] sm:$0xff]   ;;  %p1452_p3 = pnand %p1451_p1, %p1445_p8 }
  0x45   : > { %1220 = vmatmul.mubr.msk.bf16.vlgmr.msra.gmra.mxu1 %vm349_vm5, %v290_v17  ;;  %v579_v14 = vsel %vm577_vm13, 1.0, %v1516_v0  ;;  %v1379_v17 = vld [vmem:[#allocation5 + $0x10] sm:$0xff]   ;;  %v1387_v23 = vld [vmem:[#allocation5 + $0x40] sm:$0xff]  }
  0x46   : > { %1237 = vmatprep.mubr.msk.bf16.mxu1 %vm1517_vm0, %v1516_v0  ;;  %v324_v27 = vsel %vm312_vm4, %v319_v26, %v323_v24  ;;  %v580_v15 = vpack.c.bf16 %v579_v14, %v578_v13 }
  0x47   : > { %1208 = vmatmul.mubr.msk.bf16.vlgmr.msra.gmra.mxu0 %vm349_vm5, %v324_v27 }
  0x48   : > { %1224 = vmatpush3.bf16.msra.mxu0 %v1370_v25  ;;  %1231 = vmatprep.mubr.msk.bf16.mxu0 %vm1517_vm0, %v1516_v0 }
  0x49   : > { %1225 = vmatprep.subr.bf16.mxu0 %v1516_v0 }
  0x4c   : > { %1226 = vmatpush3.bf16.msra.mxu0 %v1371_v28 }
  0x4d   : > { %1227 = vmatprep.subr.bf16.mxu0 %v1516_v0 }
  0x50   : > { %1228 = vmatpush3.bf16.msra.mxu0 %v1372_v29 }
  0x51   : > { %1229 = vmatprep.subr.bf16.mxu0 %v1516_v0 }
  0x54   : > { %1230 = vmatpush3.bf16.msra.mxu0 %v1373_v30 }
  0x55   : > { %1247 = vmatprep.subr.bf16.mxu0 %v1516_v0 }
  0x57   : > { %1232 = vmatmul.mubr.msk.bf16.vlgmr.msra.gmra.mxu0 %vm349_vm5, %v475_v33 }
  0x58   : > { %1255 = vmatprep.mubr.msk.bf16.mxu0 %vm1517_vm0, %v1516_v0  ;;  %1248 = vmatpush3.bf16.msra.mxu0 %v1374_v34 }
  0x59   : > { %1249 = vmatprep.subr.bf16.mxu0 %v1516_v0 }
  0x5c   : > { %1250 = vmatpush3.bf16.msra.mxu0 %v1375_v35 }
  0x5d   : > { %1251 = vmatprep.subr.bf16.mxu0 %v1516_v0 }
  0x60   : > { %1252 = vmatpush3.bf16.msra.mxu0 %v1376_v36  ;;  %v1386_v36 = vld [vmem:[%s1802_s5 + $0x10] sm:$0xff]  }
  0x61   : > { %1253 = vmatprep.subr.bf16.mxu0 %v1516_v0 }
  0x64   : > { %1254 = vmatpush3.bf16.msra.mxu0 %v1377_v37  ;;  %v914_v37 = vpack.c.bf16 %v1664_v10, %v1664_v10  ;;  %v1389_v10 = vld [vmem:[%s1802_s5] sm:$0xff]  }
  0x65   : > { %1271 = vmatprep.subr.bf16.mxu0 %v1516_v0 }
 0x105   : > { %v454_v38 = vpop.f32.mrf.mxu1 }
 0x107   : > { %v1221_v39 = vpop.f32.mrf.mxu1  ;;  %v387_v40 = vpop.f32.mrf.mxu0 }
 0x108   : > { %v455_v48 = vadd.f32 %v454_v38, %v387_v40  ;;  %v926_v38 = vshll.u32 %v913_v32, 16  ;;  %v1388_v39 = vld [vmem:[%s1802_s5 + $0x8] sm:$0xff]   ;;  %v924_v40 = vshrl.u32 %v913_v32, 16 }
 0x109   : > { %v457_v41 = vpop.f32.mrf.mxu1  ;;  %v1209_v42 = vpop.f32.mrf.mxu0 }
 0x10a   : > { %v931_v42 = vshll.u32 %v914_v37, 16 }
 0x10b   : > { %v1222_v43 = vpop.f32.mrf.mxu1  ;;  %v390_v44 = vpop.f32.mrf.mxu0 }
 0x10c   : > { %v458_v55 = vadd.f32 %v457_v41, %v390_v44  ;;  %v928_v41 = vrot.slane %v926_v38, 1  ;;  %v933_v46 = vrot.slane %v931_v42, 1 }
 0x10d   : > { %v1210_v45 = vpop.f32.mrf.mxu0 }
 0x10e   : > { %v929_v45 = vor.u32 %v928_v41, %v924_v40 }
 0x110   : > { %v934_v47 = vsel %vm312_vm4, %v929_v45, %v933_v46 }
 0x117   : > { %v537_v50 = vpop.f32.mrf.mxu0 }
 0x118   : > { %v544_v52 = vadd.f32 %v537_v50, %v455_v48 }
 0x119   : > { %v1233_v53 = vpop.f32.mrf.mxu0 }
 0x11a   : > { %v553_v56 = vadd.f32 %v1128_v51, %v544_v52 }
 0x11b   : > { %v540_v59 = vpop.f32.mrf.mxu0 }
 0x11c   : > { %v545_v60 = vadd.f32 %v540_v59, %v458_v55  ;;  %v557_v62 = vmul.f32 0.2, %v553_v56  ;;  %vm555_vm9 = vcmp.gt.f32.partialorder %v553_v56, 0.0 }
 0x11d   : > { %v1234_v61 = vpop.f32.mrf.mxu0 }
 0x11e   : > { %v554_v63 = vadd.f32 %v1128_v51, %v545_v60  ;;  %v559_v4 = vsel %vm555_vm9, %v553_v56, %v557_v62 }
 0x120   : > { %vm556_vm10 = vcmp.gt.f32.partialorder %v554_v63, 0.0  ;;  %v558_v1 = vmul.f32 0.2, %v554_v63 }
 0x122   : > { %v560_v5 = vsel %vm556_vm10, %v554_v63, %v558_v1 }
 0x123   : > { %v561_v11 = vpack.c.bf16 %v560_v5, %v559_v4 }
 0x125   : > { %1236 = vmatpush3.bf16.msra.mxu1 %v561_v11  ;;  %1256 = vmatmul.mubr.msk.bf16.vlgmr.msra.gmra.mxu0 %vm349_vm5, %v561_v11 }
 0x126   : > { %1241 = vmatprep.subr.bf16.mxu1 %v1516_v0  ;;  %1279 = vmatprep.mubr.msk.bf16.mxu0 %vm1517_vm0, %v1516_v0 }
 0x127   : > { %1272 = vmatpush3.bf16.msra.mxu0 %v1381_v19 }
 0x128   : > { %1238 = vmatmul.mubr.msk.bf16.vlgmr.msra.gmra.mxu1 %vm581_vm11, %v573_v12  ;;  %1273 = vmatprep.subr.bf16.mxu0 %v1516_v0 }
 0x129   : > { %1242 = vmatpush3.bf16.msra.mxu1 %v561_v11  ;;  %1243 = vmatprep.mubr.msk.bf16.mxu1 %vm1517_vm0, %v1516_v0 }
 0x12a   : > { %1259 = vmatprep.subr.bf16.mxu1 %v1516_v0 }
 0x12b   : > { %1274 = vmatpush3.bf16.msra.mxu0 %v1383_v21 }
 0x12c   : > { %1275 = vmatprep.subr.bf16.mxu0 %v1516_v0 }
 0x12f   : > { %1276 = vmatpush3.bf16.msra.mxu0 %v1385_v22 }
 0x130   : > { %1244 = vmatmul.mubr.msk.bf16.vlgmr.msra.gmra.mxu1 %vm581_vm11, %v580_v15  ;;  %1277 = vmatprep.subr.bf16.mxu0 %v1516_v0 }
 0x131   : > { %1260 = vmatpush3.bf16.msra.mxu1 %v1378_v16  ;;  %1267 = vmatprep.mubr.msk.bf16.mxu1 %vm1517_vm0, %v1516_v0 }
 0x132   : > { %1261 = vmatprep.subr.bf16.mxu1 %v1516_v0 }
 0x133   : > { %1278 = vmatpush3.bf16.msra.mxu0 %v1387_v23 }
 0x135   : > { %1262 = vmatpush3.bf16.msra.mxu1 %v1379_v17 }
 0x136   : > { %1263 = vmatprep.subr.bf16.mxu1 %v1516_v0 }
 0x139   : > { %1264 = vmatpush3.bf16.msra.mxu1 %v1380_v18 }
 0x13a   : > { %1265 = vmatprep.subr.bf16.mxu1 %v1516_v0 }
 0x13d   : > { %1266 = vmatpush3.bf16.msra.mxu1 %v1382_v20 }
 0x13e   : > { %1283 = vmatprep.subr.bf16.mxu1 %v1516_v0 }
 0x1e5   : > { %v750_v24 = vpop.f32.mrf.mxu0 }
 0x1e7   : > { %v1257_v25 = vpop.f32.mrf.mxu0 }
 0x1e8   : > { %v619_v26 = vpop.f32.mrf.mxu1 }
 0x1e9   : > { %v753_v27 = vpop.f32.mrf.mxu0 }
 0x1ea   : > { %v1239_v28 = vpop.f32.mrf.mxu1 }
 0x1eb   : > { %v1258_v29 = vpop.f32.mrf.mxu0 }
 0x1ec   : > { %v622_v30 = vpop.f32.mrf.mxu1 }
 0x1ed   : > { %v626_v33 = vpack.c.bf16 %v622_v30, %v619_v26 }
 0x1ee   : > { %v1240_v34 = vpop.f32.mrf.mxu1 }
 0x1ef   : > { %1268 = vmatmul.mubr.msk.bf16.vlgmr.msra.gmra.mxu1 %vm349_vm5, %v626_v33 }
 0x1f0   : > { %1284 = vmatpush3.bf16.msra.mxu1 %v1384_v31  ;;  %v664_v35 = vpop.f32.mrf.mxu1  ;;  %1291 = vmatprep.mubr.msk.bf16.mxu1 %vm1517_vm0, %v1516_v0 }
 0x1f1   : > { %1285 = vmatprep.subr.bf16.mxu1 %v1516_v0 }
 0x1f2   : > { %v1245_v8 = vpop.f32.mrf.mxu1 }
 0x1f4   : > { %1286 = vmatpush3.bf16.msra.mxu1 %v1386_v36  ;;  %v667_v9 = vpop.f32.mrf.mxu1 }
 0x1f5   : > { %v671_v43 = vpack.c.bf16 %v667_v9, %v664_v35  ;;  %1287 = vmatprep.subr.bf16.mxu1 %v1516_v0 }
 0x1f6   : > { %v1246_v44 = vpop.f32.mrf.mxu1 }
 0x1f7   : > { %1280 = vmatmul.mubr.msk.bf16.vlgmr.msra.gmra.mxu0 %vm349_vm5, %v671_v43 }
 0x1f8   : > { %1288 = vmatpush3.bf16.msra.mxu1 %v1388_v39 }
 0x1f9   : > { %1289 = vmatprep.subr.bf16.mxu1 %v1516_v0  ;;  %v1148_v0 = vld [vmem:[%s1801_s4] ss:$0 sm:$0xff] }
 0x1fc   : > { %1290 = vmatpush3.bf16.msra.mxu1 %v1389_v10 }
 0x1ff   : > { %1292 = vmatmul.mubr.msk.bf16.vlgmr.msra.gmra.mxu1 %vm349_vm5, %v934_v47 }
 0x2af   : > { %v818_v48 = vpop.f32.mrf.mxu1 }
 0x2b0   : > { %v819_v53 = vadd.f32 %v818_v48, %v750_v24 }
 0x2b1   : > { %v1269_v49 = vpop.f32.mrf.mxu1 }
 0x2b3   : > { %v821_v50 = vpop.f32.mrf.mxu1 }
 0x2b4   : > { %v822_v57 = vadd.f32 %v821_v50, %v753_v27 }
 0x2b5   : > { %v1270_v51 = vpop.f32.mrf.mxu1 }
 0x2b7   : > { %v895_v52 = vpop.f32.mrf.mxu0 }
 0x2b8   : > { %v902_v55 = vadd.f32 %v895_v52, %v819_v53 }
 0x2b9   : > { %v1281_v54 = vpop.f32.mrf.mxu0 }
 0x2ba   : > { %v911_v60 = vadd.f32 %v1148_v0, %v902_v55 }
 0x2bb   : > { %v898_v56 = vpop.f32.mrf.mxu0 }
 0x2bc   : > { %v903_v59 = vadd.f32 %v898_v56, %v822_v57 }
 0x2bd   : > { %v1282_v58 = vpop.f32.mrf.mxu0 }
 0x2be   : > { %v912_v1 = vadd.f32 %v1148_v0, %v903_v59 }
 0x2bf   : > { %v996_v61 = vpop.f32.mrf.mxu1 }
 0x2c0   : > { %v997_v62 = vadd.f32 %v996_v61, %v911_v60 }
 0x2c1   : > { %v1293_v63 = vpop.f32.mrf.mxu1 }
 0x2c2   : > { %1003 = vst [vmem:[%s274_s12] sm:$0xff] %v997_v62 }
 0x2c3   : > { %v999_v2 = vpop.f32.mrf.mxu1 }
 0x2c4   : > { %v1000_v3 = vadd.f32 %v999_v2, %v912_v1 }
 0x2c5   : > { %v1294_v4 = vpop.f32.mrf.mxu1 }
 0x2c6   : > { %1004 = vst [vmem:[%s274_s12 + $0x8] sm:$0xff] %v1000_v3 }
 0x2c7   : > { %1455 = shalt.err (!%p1452_p3)
}
 0x2c8   : > { %s1456_s28 = scalar_lea.hbm %s1755_s17, 256  ;;  %s1460_s10 = scalar_lea.hbm %s1803_s6, 512 }
 0x2c9   : > { %p1457_p2 = scmp.ne.s32.totalorder %s1755_s17, %s1456_s28  ;;  %p1461_p7 = scmp.lt.s32.totalorder %s1755_s17, %s1803_s6 }
 0x2ca   : > { %p1462_p6 = scmp.lt.s32.totalorder %s1460_s10, %s1456_s28 }
 0x2cb   : > { %p1458_p4 = pnand %p1457_p2, %p1594_p5 }
 0x2cc   : > { %p1463_p9 = por %p1462_p6, %p1461_p7 }
 0x2cd   : > { %p1459_p13 = pneg %p1458_p4 }
 0x2cf   : > { %p1464_p10 = pnand %p1463_p9, %p1459_p13 }
 0x2d1   : > { %1467 = shalt.err (!%p1464_p10)
}
 0x2d2   : > { %s1519_s14 = smov 128   ;;  %s1520_s15 = smov 8  }
 0x2d3   : > { %1304 = dma.vmem_to_hbm [thread:$0]  (%p1594_p5), %s1750_s13, 256, %s1755_s17, %s1757_s18, %s1519_s14, %s1519_s14, %s1520_s15  }
 0x2d4 PF: > { %p1321_p12 = scmp.ge.s32.totalorder %s1510_s24, 2  ;;  %s1034_s16 = sand.u32 1, %s1498_s21  }
 0x2d5   : > { %p1813_p8 = scmp.ne.s32.totalorder %s1806_s8, 0  ;;  %s1035_s25 = scalar_lea.sflag [#allocation4], %s1034_s16 }
 0x2d7   : > { %p1314_p11 = pnand %p1321_p12, %p1813_p8 }
 0x2d9   : > { %p1315_p0 = pneg %p1314_p11 }
 0x2db   : > { %1493 = dma.done.wait (%p1315_p0), %s1035_s25, 256  }
 0x2dc   : > { %1495 = vsyncadd (%p1315_p0), %s1035_s25, 4294967040  ;;  %p18_p1 = scmp.ge.s32.totalorder %s1581_s27, 4   ;;  %s1814_s21 = smov %s1502_s22 }
 0x2dd   : > { %s1815_s22 = smov %s1506_s23  ;;  %s1816_s23 = smov %s1592_s30 }
 0x2de   : > { %s1817_s24 = smov %s1581_s27  ;;  %20 = sbr.rel (!%p18_p1) target bundleno = 5 (0x5), region = 92 }
 0x2e3   :  { %1040 = vsyncpa [#allocation3], 1 }
 0x2e4   :  { %1042 = vsyncpa [#allocation3 + $0x1], 1 }
 0x2e5   :  { %1043 = vsyncpa [#allocation6], 1 }
 0x2e6   :  { %1044 = vsyncpa [#allocation4], 1 }
 0x2e7   :  { %1046 = vsyncpa [#allocation4 + $0x1], 1 }

</bundles_post_ra>
